<compile_context>
chip_gen: v6e
topology: v6e:2x2x1
jax: 0.10.0
libtpu: 0.0.40
codegen_flags: <defaults>
</compile_context>

<pallas_src>
import functools

import jax
import jax.numpy as jnp
from jax.experimental import pallas as pl
from jax.experimental.pallas import tpu as pltpu


_LANE = 128
_SUBLANE = 8
# Target footprint for the double-buffered in+out blocks of one grid step.
_TILE_BUDGET_BYTES = 8 * 1024 * 1024


def _mbstd_tile_kernel(x_ref, out_ref, psum_ref, *, alpha: float, C: int):
    """One (B, C, thw) tile: passthrough copy + partial sum of per-location std."""
    x = x_ref[...]                                    # (B, C, thw), original dtype

    # (a) passthrough: first C output channels are a copy of x (no f32 copy held).
    out_ref[:, :C, :] = x
    # Appended channel slot: deterministic filler, overwritten by the epilogue.
    out_ref[:, C, :] = jnp.zeros((x.shape[0], x.shape[2]), dtype=out_ref.dtype)

    # (b) reduction in f32, cast tile-by-tile only.
    xf = x.astype(jnp.float32)
    mean_b = jnp.mean(xf, axis=0, keepdims=True)      # (1, C, thw)
    y = xf - mean_b
    var = jnp.mean(y * y, axis=0)                     # (C, thw), biased (divide by B)
    std = jnp.sqrt(var + jnp.float32(alpha))
    tile_sum = jnp.sum(std)                           # scalar partial sum

    # Broadcast the partial sum over an aligned (8, 128) block; each grid step
    # writes a disjoint block, keeping the grid axis "parallel"-safe.
    psum_ref[...] = jnp.full(psum_ref.shape, tile_sum, dtype=jnp.float32)


def _choose_hw_tile(B: int, C: int, HW: int, itemsize: int) -> int:
    """Largest multiple-of-128 divisor of HW whose double-buffered in+out blocks
    fit the VMEM budget; falls back to full HW when it is not lane-aligned."""
    if HW % _LANE != 0:
        return HW  # small / odd spatial sizes: single full-width block (exempt)
    per_lane_bytes = 2 * (B * C + B * (C + 1)) * itemsize   # 2x in + 2x out
    max_thw = max(_LANE, _TILE_BUDGET_BYTES // max(per_lane_bytes, 1))
    best = _LANE
    m = HW // _LANE
    for d in range(1, m + 1):
        if m % d == 0:
            cand = d * _LANE
            if best < cand <= max_thw:
                best = cand
    return best


def minibatch_stddev(x: jax.Array, alpha: float = 1e-8) -> jax.Array:
    """MinibatchStdDev forward. x: (B, C, H, W) NCHW -> (B, C+1, H, W)."""
    B, C, H, W = x.shape
    HW = H * W
    itemsize = jnp.dtype(x.dtype).itemsize

    # Lane-dense view: H*W on the lane axis (metadata-only reshape).
    x3 = x.reshape(B, C, HW)

    thw = _choose_hw_tile(B, C, HW, itemsize)
    num_hw = HW // thw

    # Explicit VMEM budget valid across v5e / v6e / v7x, with headroom above
    # the actual double-buffered footprint.
    footprint = 2 * (B * C * thw + B * (C + 1) * thw) * itemsize + 64 * 1024
    vmem_limit = min(max(32 * 1024 * 1024, (footprint * 5) // 4), 64 * 1024 * 1024)

    kernel = functools.partial(_mbstd_tile_kernel, alpha=alpha, C=C)

    cost = pl.CostEstimate(
        flops=4 * B * C * HW,
        transcendentals=C * HW,
        bytes_accessed=(B * C * HW + B * (C + 1) * HW) * itemsize
        + _SUBLANE * num_hw * _LANE * 4,
    )

    out3, psums = pl.pallas_call(
        kernel,
        grid_spec=pltpu.PrefetchScalarGridSpec(
            num_scalar_prefetch=0,
            grid=(num_hw,),
            in_specs=[pl.BlockSpec((B, C, thw), lambda h: (0, 0, h))],
            out_specs=[
                pl.BlockSpec((B, C + 1, thw), lambda h: (0, 0, h)),
                pl.BlockSpec((_SUBLANE, _LANE), lambda h: (0, h)),
            ],
        ),
        out_shape=(
            jax.ShapeDtypeStruct((B, C + 1, HW), x.dtype),
            jax.ShapeDtypeStruct((_SUBLANE, num_hw * _LANE), jnp.float32),
        ),
        compiler_params=pltpu.CompilerParams(
            dimension_semantics=("parallel",),
            vmem_limit_bytes=vmem_limit,
        ),
        cost_estimate=cost,
    )(x3)

    # Grand mean over all C*H*W locations (one lane per tile carries the sum).
    tile_sums = psums.reshape(_SUBLANE, num_hw, _LANE)[0, :, 0]
    s = (jnp.sum(tile_sums) / jnp.float32(C * HW)).astype(x.dtype)

    # Epilogue: fill the single appended channel (B*H*W elements) in place.
    smap = jnp.full((B, 1, HW), s, dtype=x.dtype)
    out3 = jax.lax.dynamic_update_slice(out3, smap, (0, C, 0))

    return out3.reshape(B, C + 1, H, W)


def _reference(x: jax.Array, alpha: float = 1e-8) -> jax.Array:
    # pure-JAX reference matching the PyTorch semantics
    B, _, H, W = x.shape
    y = x - jnp.mean(x, axis=0, keepdims=True)
    y = jnp.sqrt(jnp.mean(y * y, axis=0) + alpha)
    s = jnp.mean(y)
    smap = jnp.full((B, 1, H, W), s, dtype=x.dtype)
    return jnp.concatenate([x, smap], axis=1)


if __name__ == "__main__":
    key = jax.random.PRNGKey(0)
    B, C, H, W = 2, 4, 16, 16
    x = jax.random.normal(key, (B, C, H, W), dtype=jnp.float32)

    mbstd = jax.jit(minibatch_stddev)
    out = jax.block_until_ready(mbstd(x))

    ref = _reference(x)
    assert out.shape == (B, C + 1, H, W), out.shape
    assert jnp.allclose(out, ref, atol=1e-5, rtol=1e-5), (
        float(jnp.max(jnp.abs(out - ref)))
    )

    print("KERNEL_OK")
</pallas_src>

<mosaic_0001>
module attributes {stable_mosaic.version = 11 : i64} {
  func.func @_mbstd_tile_kernel(%arg0: i32, %arg1: memref<2x4x256xf32, #tpu.memory_space<vmem>>, %arg2: memref<2x5x256xf32, #tpu.memory_space<vmem>>, %arg3: memref<8x128xf32, #tpu.memory_space<vmem>>) attributes {dimension_semantics = [#tpu.dimension_semantics<parallel>], iteration_bounds = array<i64: 1>, scalar_prefetch = 0 : i64, scratch_operands = 0 : i64, tpu.core_type = #tpu.core_type<tc>, window_params = [{transform_indices = @transform_0, window_bounds = array<i64: 2, 4, 256>}, {transform_indices = @transform_1, window_bounds = array<i64: 2, 5, 256>}, {transform_indices = @transform_2, window_bounds = array<i64: 8, 128>}]} {
    %c0 = arith.constant 0 : index
    %c0_0 = arith.constant 0 : index
    %c0_1 = arith.constant 0 : index
    %0 = vector.load %arg1[%c0, %c0_0, %c0_1] : memref<2x4x256xf32, #tpu.memory_space<vmem>>, vector<2x4x256xf32>
    %c0_2 = arith.constant 0 : index
    %c0_3 = arith.constant 0 : index
    %c0_4 = arith.constant 0 : index
    %1 = vector.load %arg2[%c0_2, %c0_3, %c0_4] : memref<2x5x256xf32, #tpu.memory_space<vmem>>, vector<2x4x256xf32>
    tpu.vector_store %arg2[%c0_2, %c0_3, %c0_4], %0 {strides = array<i32>} : memref<2x5x256xf32, #tpu.memory_space<vmem>>, vector<2x4x256xf32>,
    %cst = arith.constant 0.000000e+00 : f32
    %2 = vector.broadcast %cst : f32 to vector<2x256xf32>
    %c0_5 = arith.constant 0 : index
    %c4 = arith.constant 4 : index
    %c0_6 = arith.constant 0 : index
    %3 = vector.load %arg2[%c0_5, %c4, %c0_6] : memref<2x5x256xf32, #tpu.memory_space<vmem>>, vector<2x1x256xf32>
    %4 = vector.shape_cast %3 : vector<2x1x256xf32> to vector<2x256xf32>
    %5 = vector.shape_cast %2 : vector<2x256xf32> to vector<2x1x256xf32>
    tpu.vector_store %arg2[%c0_5, %c4, %c0_6], %5 {strides = array<i32>} : memref<2x5x256xf32, #tpu.memory_space<vmem>>, vector<2x1x256xf32>,
    %cst_7 = arith.constant dense<0.000000e+00> : vector<4x256xf32>
    %6 = vector.multi_reduction <add>, %0, %cst_7 [0] : vector<2x4x256xf32> to vector<4x256xf32>
    %7 = vector.shape_cast %6 : vector<4x256xf32> to vector<1x4x256xf32>
    %cst_8 = arith.constant 2.000000e+00 : f32
    %8 = vector.broadcast %cst_8 : f32 to vector<1x4x256xf32>
    %9 = arith.divf %7, %8 : vector<1x4x256xf32>
    %10 = vector.broadcast %9 : vector<1x4x256xf32> to vector<2x4x256xf32>
    %11 = arith.subf %0, %10 : vector<2x4x256xf32>
    %12 = arith.mulf %11, %11 : vector<2x4x256xf32>
    %cst_9 = arith.constant dense<0.000000e+00> : vector<4x256xf32>
    %13 = vector.multi_reduction <add>, %12, %cst_9 [0] : vector<2x4x256xf32> to vector<4x256xf32>
    %cst_10 = arith.constant 2.000000e+00 : f32
    %14 = vector.broadcast %cst_10 : f32 to vector<4x256xf32>
    %15 = arith.divf %13, %14 : vector<4x256xf32>
    %cst_11 = arith.constant 9.99999993E-9 : f32
    %16 = vector.broadcast %cst_11 : f32 to vector<4x256xf32>
    %17 = arith.addf %15, %16 : vector<4x256xf32>
    %18 = math.sqrt %17 : vector<4x256xf32>
    %19 = vector.shape_cast %18 : vector<4x256xf32> to vector<1x4x256xf32>
    %cst_12 = arith.constant dense<0.000000e+00> : vector<1xf32>
    %20 = vector.multi_reduction <add>, %19, %cst_12 [1, 2] : vector<1x4x256xf32> to vector<1xf32>
    %21 = vector.shape_cast %20 : vector<1xf32> to vector<1x1x1xf32>
    %22 = vector.extract %21[0, 0, 0] : f32 from vector<1x1x1xf32>
    %23 = vector.broadcast %22 : f32 to vector<8x128xf32>
    %c0_13 = arith.constant 0 : index
    %c0_14 = arith.constant 0 : index
    %24 = vector.load %arg3[%c0_13, %c0_14] : memref<8x128xf32, #tpu.memory_space<vmem>>, vector<8x128xf32>
    tpu.vector_store %arg3[%c0_13, %c0_14], %23 {strides = array<i32>} : memref<8x128xf32, #tpu.memory_space<vmem>>, vector<8x128xf32>,
    return
  }
  func.func @transform_0(%arg0: i32) -> (i32, i32, i32) {
    %c0_i32 = arith.constant 0 : i32
    %c0_i32_0 = arith.constant 0 : i32
    %c0_i32_1 = arith.constant 0 : i32
    return %c0_i32, %c0_i32_0, %arg0 : i32, i32, i32
  }
  func.func @transform_1(%arg0: i32) -> (i32, i32, i32) {
    %c0_i32 = arith.constant 0 : i32
    %c0_i32_0 = arith.constant 0 : i32
    %c0_i32_1 = arith.constant 0 : i32
    return %c0_i32, %c0_i32_0, %arg0 : i32, i32, i32
  }
  func.func @transform_2(%arg0: i32) -> (i32, i32) {
    %c0_i32 = arith.constant 0 : i32
    %c0_i32_0 = arith.constant 0 : i32
    return %c0_i32, %arg0 : i32, i32
  }
}

</mosaic_0001>

<bundles_post_ra>
// kernel: minibatch_stddev.1
= control target key start
LH: loop header
LB: loop body
LE: loop exit
PB: predicated region body
PF: predicated region fallthrough
CT: control target
= control target key end

     0   :  { %v22_v0 = vlaneseq  ;;  %vm32_vm0 = vcmask 1043456   ;;  %v113_v6 = vmov 0.0   ;;  %s166_s0 = inlined_call_operand.vmem [shape: f32[2,4,256], index: 0, kind: input, shape index: {}]   ;;  %s167_s1 = inlined_call_operand.vmem [shape: f32[2,5,256], index: 1, kind: output, shape index: {0}]   ;;  %s168_s2 = inlined_call_operand.vmem [shape: f32[8,128], index: 2, kind: output, shape index: {1}]  }
   0x1   :  { %v10_v1 = vld [vmem:[%s166_s0] sm:$0xff]  ;;  %v11_v2 = vld [vmem:[%s166_s0 + $0x8] sm:$0xff] }
   0x2   :  { %v14_v3 = vcombine.high %v10_v1, %v10_v1  ;;  %v15_v4 = vcombine.high %v11_v2, %v11_v2  ;;  %18 = vst [vmem:[%s167_s1] sm:$0xf] %v10_v1  ;;  %20 = vst [vmem:[%s167_s1 + $0x10] sm:$0xf] %v11_v2  ;;  %vm24_vm1 = vcmp.lt.s32.totalorder %v22_v0, 256  ;;  %v33_v5 = vsel %vm32_vm0, %v10_v1, 0.0 }
   0x3   :  { %102 = vst.msk [vmem:[%s167_s1 + $0x4] ss:$8 sm:$0x3] %vm24_vm1, %v113_v6  ;;  %103 = vst.msk [vmem:[%s167_s1 + $0x14] ss:$8 sm:$0x3] %vm24_vm1, %v113_v6 }
   0x4   :  { %v34_v7 = vsel %vm32_vm0, %v11_v2, 0.0  ;;  %19 = vst [vmem:[%s167_s1 + $0x8] sm:$0xf] %v14_v3  ;;  %21 = vst [vmem:[%s167_s1 + $0x18] sm:$0xf] %v15_v4  ;;  %v36_v9 = vsel %vm32_vm0, %v14_v3, 0.0 }
   0x5   :  { %v35_v8 = vadd.f32 %v34_v7, %v33_v5  ;;  %v37_v10 = vsel %vm32_vm0, %v15_v4, 0.0 }
   0x6   :  { %v38_v11 = vadd.f32 %v37_v10, %v36_v9 }
   0x7   :  { %v40_v12 = vmul.f32 0.5, %v35_v8 }
   0x8   :  { %v41_v13 = vmul.f32 0.5, %v38_v11 }
   0xa   :  { %v44_v14 = vcombine.low %v40_v12, %v41_v13 }
   0xc   :  { %v46_v15 = vsub.f32 %v10_v1, %v44_v14  ;;  %v47_v16 = vsub.f32 %v11_v2, %v44_v14 }
   0xe   :  { %v48_v17 = vmul.f32 %v46_v15, %v46_v15  ;;  %v49_v18 = vmul.f32 %v47_v16, %v47_v16 }
  0x10   :  { %v52_v19 = vcombine.high %v48_v17, %v48_v17  ;;  %v53_v20 = vcombine.high %v49_v18, %v49_v18  ;;  %v56_v21 = vsel %vm32_vm0, %v48_v17, 0.0  ;;  %v57_v22 = vsel %vm32_vm0, %v49_v18, 0.0 }
  0x11   :  { %v58_v23 = vadd.f32 %v57_v22, %v56_v21 }
  0x12   :  { %v59_v24 = vsel %vm32_vm0, %v52_v19, 0.0  ;;  %v60_v25 = vsel %vm32_vm0, %v53_v20, 0.0 }
  0x13   :  { %v61_v26 = vadd.f32 %v60_v25, %v59_v24  ;;  %v62_v27 = vmul.f32 0.5, %v58_v23 }
  0x15   :  { %v63_v28 = vmul.f32 0.5, %v61_v26  ;;  %v64_v29 = vadd.f32 1e-08, %v62_v27 }
  0x17   :  { %v65_v30 = vadd.f32 1e-08, %v63_v28  ;;  %109 = vrsqrt.f32 %v64_v29  ;;  %vm68_vm2 = vcmp.eq.f32.partialorder %v64_v29, inf  ;;  %v71_v32 = vand.u32 2147483648, %v64_v29 }
  0x18   :  { %vm70_vm3 = vcmp.eq.f32.partialorder %v64_v29, 0.0 }
  0x19   :  { %111 = vrsqrt.f32 %v65_v30  ;;  %vm75_vm4 = vcmp.eq.f32.partialorder %v65_v30, inf  ;;  %v78_v35 = vand.u32 2147483648, %v65_v30  ;;  %vm77_vm5 = vcmp.eq.f32.partialorder %v65_v30, 0.0 }
  0x24   :  { %v110_v31 = vpop.eup %109 }
  0x25   :  { %v67_v33 = vmul.f32 %v110_v31, %v64_v29 }
  0x26   :  { %v112_v34 = vpop.eup %111 }
  0x27   :  { %v69_v36 = vsel %vm68_vm2, %v64_v29, %v67_v33  ;;  %v74_v37 = vmul.f32 %v112_v34, %v65_v30 }
  0x28   :  { %v72_v38 = vsel %vm70_vm3, %v71_v32, %v69_v36 }
  0x29   :  { %v76_v39 = vsel %vm75_vm4, %v65_v30, %v74_v37  ;;  %v80_v40 = vsel %vm32_vm0, %v72_v38, 0.0 }
  0x2a   :  { %v79_v41 = vsel %vm77_vm5, %v78_v35, %v76_v39 }
  0x2b   :  { %v81_v42 = vsel %vm32_vm0, %v79_v41, 0.0 }
  0x2c   :  { %v82_v43 = vadd.f32 %v81_v42, %v80_v40 }
  0x2e   :  { %83 = vadd.xlane.f32.xlu0 %v82_v43 }
  0xb7   :  { %v84_v44 = vpop.xlane.xlu0 %83 }
  0xb8   :  { %v85_v45 = vrot.slane %v84_v44, 4 }
  0xba   :  { %v86_v46 = vadd.f32 %v85_v45, %v84_v44 }
  0xbc   :  { %v87_v47 = vrot.slane %v86_v46, 2 }
  0xbe   :  { %v88_v48 = vadd.f32 %v87_v47, %v86_v46 }
  0xc0   :  { %v89_v49 = vrot.slane %v88_v48, 1 }
  0xc2   :  { %v90_v50 = vadd.f32 %v89_v49, %v88_v48 }
  0xc4   :  { %104 = vpush %v90_v50 }
  0xf5   :  { %s105_s1 = spop %104 }
  0xf6   :  { %v92_v51 = vstv %s105_s1 }
  0xf7   :  { %93 = vst [vmem:[%s168_s2] sm:$0xff] %v92_v51 }

</bundles_post_ra>
